<compile_context>
chip_gen: v7x
topology: tpu7x:2x2x1
jax: 0.10.0
libtpu: 0.0.40
codegen_flags: <defaults>
</compile_context>

<pallas_src>
import functools

import jax
import jax.numpy as jnp
from jax import lax
from jax.experimental import pallas as pl
from jax.experimental.pallas import tpu as pltpu


# ----------------------------------------------------------------------------
# Pallas kernel: one GEMM (im2col-LHS x weight) + LeakyReLU per grid step.
# ----------------------------------------------------------------------------
def _gemm_lrelu_kernel(lhs_ref, w_ref, o_ref, *, od, neg):
    """lhs_ref: (Mb, Kpad)      bf16 im2col patches for this grid step (lane-dense K)
       w_ref:   (Kpad, od_pad)  bf16 weight, resident across grid steps
       o_ref:   (od, Mb)        f32 conv + LeakyReLU output, spatial axis in lanes
    """
    acc = jnp.dot(lhs_ref[...], w_ref[...],
                  preferred_element_type=jnp.float32)          # (Mb, od_pad) f32 on MXU
    y = jnp.where(acc >= 0.0, acc, neg * acc)                  # LeakyReLU epilogue (VPU)
    yt = y.T                                                   # (od_pad, Mb)
    o_ref[...] = yt[:od, :].astype(o_ref.dtype)


def conv_gemm_lrelu_pallas(lhs, w2, *, n, ho, wo, od, od_pad, kpad, neg=0.2):
    mb = ho * wo                       # rows per grid step (one image)
    assert lhs.shape == (n * mb, kpad)
    assert w2.shape == (kpad, od_pad)
    assert mb % 8 == 0                 # sublane alignment of the M block

    # VMEM budget derived from the real block sizes (double-buffered) + headroom.
    lhs_blk = mb * kpad * 2            # bf16
    w_blk = kpad * od_pad * 2          # bf16
    out_blk = od * mb * 4              # f32
    vmem_limit = int(2 * (lhs_blk + w_blk + out_blk) + (4 << 20))

    kernel = functools.partial(_gemm_lrelu_kernel, od=od, neg=neg)
    return pl.pallas_call(
        kernel,
        out_shape=jax.ShapeDtypeStruct((n, od, mb), jnp.float32),
        grid=(n,),
        in_specs=[
            pl.BlockSpec((mb, kpad), lambda i: (i, 0)),        # per-image im2col rows
            pl.BlockSpec((kpad, od_pad), lambda i: (0, 0)),    # weight: resident
        ],
        out_specs=pl.BlockSpec((None, od, mb), lambda i: (i, 0, 0)),
        compiler_params=pltpu.CompilerParams(
            dimension_semantics=("parallel",),                 # >=2 steps -> both v7x TCs
            vmem_limit_bytes=vmem_limit,
        ),
    )(lhs, w2)


# ----------------------------------------------------------------------------
# EncoderBlock forward: one-pass BN stats + fused affine/pad/im2col prologue (XLA),
# then the single Pallas GEMM + LeakyReLU kernel.
# ----------------------------------------------------------------------------
def encoder_block_forward(x_nchw, gamma, beta, w_oihw, *, stride, padding, eps=1e-5,
                          negative_slope=0.2):
    n, c, h, w = x_nchw.shape
    od, in_dim, kh_, kw_ = w_oihw.shape
    assert in_dim == c and kh_ == kw_
    k, s, p = kh_, stride, padding

    ho = (h + 2 * p - k) // s + 1
    wo = (w + 2 * p - k) // s + 1
    kdim = k * k * c
    kpad = ((kdim + 127) // 128) * 128       # lane-dense K for the im2col LHS
    od_pad = ((od + 127) // 128) * 128       # lane-dense N for the GEMM RHS / accumulator

    # --- BatchNorm2d (training-mode) statistics in ONE pass over x ---
    cnt = n * h * w
    s1 = jnp.sum(x_nchw, axis=(0, 2, 3))
    s2 = jnp.sum(x_nchw * x_nchw, axis=(0, 2, 3))
    mean = s1 / cnt
    var = jnp.maximum(s2 / cnt - mean * mean, 0.0)   # biased variance (matches PyTorch BN)
    scale = gamma * lax.rsqrt(var + eps)
    shift = beta - mean * scale

    # --- fused XLA prologue: NHWC + affine + zero-pad + im2col, then bf16 cast ---
    xs = jnp.transpose(x_nchw, (0, 2, 3, 1)) * scale + shift        # normalize (NHWC)
    xs = jnp.pad(xs.astype(jnp.bfloat16), ((0, 0), (p, p), (p, p), (0, 0)))
    taps = []
    for kh in range(k):
        for kw in range(k):
            taps.append(xs[:, kh:kh + s * (ho - 1) + 1:s, kw:kw + s * (wo - 1) + 1:s, :])
    patches = jnp.stack(taps, axis=3)                # (N, Ho, Wo, k*k, C)
    lhs = patches.reshape(n * ho * wo, kdim)         # K index = (kh*k + kw)*C + ci
    lhs = jnp.pad(lhs, ((0, 0), (0, kpad - kdim)))   # zero-pad K to 128 (lane-dense)

    # --- weight: (O,I,Kh,Kw) -> (k*k*C, od), padded to (Kpad, od_pad), bf16 ---
    w2 = jnp.transpose(w_oihw, (2, 3, 1, 0)).reshape(kdim, od)
    w2 = jnp.pad(w2, ((0, kpad - kdim), (0, od_pad - od))).astype(jnp.bfloat16)

    out = conv_gemm_lrelu_pallas(lhs, w2, n=n, ho=ho, wo=wo, od=od, od_pad=od_pad,
                                 kpad=kpad, neg=negative_slope)
    # (N, od, Ho*Wo) -> (N, od, Ho, Wo): pure reshape, no transpose needed.
    return out.reshape(n, od, ho, wo)


# ----------------------------------------------------------------------------
# Pure-JAX f32 reference for verification.
# ----------------------------------------------------------------------------
def encoder_block_reference(x, gamma, beta, w, *, stride, padding, eps=1e-5):
    mean = x.mean(axis=(0, 2, 3), keepdims=True)
    var = ((x - mean) ** 2).mean(axis=(0, 2, 3), keepdims=True)
    xn = (x - mean) / jnp.sqrt(var + eps) * gamma.reshape(1, -1, 1, 1) + beta.reshape(1, -1, 1, 1)
    y = lax.conv_general_dilated(
        xn, w, window_strides=(stride, stride),
        padding=[(padding, padding), (padding, padding)],
        dimension_numbers=("NCHW", "OIHW", "NCHW"),
    )
    return jnp.where(y >= 0, y, 0.2 * y)


if __name__ == "__main__":
    # EncoderBlock(in_dim=4, out_dim=8, kernel=3, stride=2, padding=1)
    in_dim, out_dim, kernel, stride, padding = 4, 8, 3, 2, 1
    N, H, W = 2, 16, 16

    key = jax.random.PRNGKey(0)
    kx, kg, kb, kw_ = jax.random.split(key, 4)
    x = jax.random.normal(kx, (N, in_dim, H, W), dtype=jnp.float32)
    gamma = 1.0 + 0.1 * jax.random.normal(kg, (in_dim,), dtype=jnp.float32)
    beta = 0.1 * jax.random.normal(kb, (in_dim,), dtype=jnp.float32)
    w = 0.1 * jax.random.normal(kw_, (out_dim, in_dim, kernel, kernel), dtype=jnp.float32)

    out = encoder_block_forward(x, gamma, beta, w, stride=stride, padding=padding)
    out = jax.block_until_ready(out)

    ref = encoder_block_reference(x, gamma, beta, w, stride=stride, padding=padding)
    assert out.shape == ref.shape, (out.shape, ref.shape)
    max_err = float(jnp.max(jnp.abs(out - ref)))
    # bf16 operands (f32 accumulation) -> loosened tolerance vs the f32 reference.
    assert jnp.allclose(out, ref, atol=3e-2, rtol=3e-2), max_err

    print("KERNEL_OK")
</pallas_src>

<mosaic_0001>
module attributes {stable_mosaic.version = 11 : i64} {
  func.func @_gemm_lrelu_kernel(%arg0: i32, %arg1: memref<64x128xbf16, #tpu.memory_space<vmem>>, %arg2: memref<128x128xbf16, #tpu.memory_space<vmem>>, %arg3: memref<1x8x64xf32, #tpu.memory_space<vmem>>) attributes {dimension_semantics = [#tpu.dimension_semantics<parallel>], iteration_bounds = array<i64: 2>, scalar_prefetch = 0 : i64, scratch_operands = 0 : i64, tpu.core_type = #tpu.core_type<tc>, window_params = [{transform_indices = @transform_0, window_bounds = array<i64: 64, 128>}, {pipeline_mode = #tpu.pipeline_mode<synchronous>, transform_indices = @transform_1, window_bounds = array<i64: 128, 128>}, {transform_indices = @transform_2, window_bounds = array<i64: 1, 8, 64>}]} {
    %c0 = arith.constant 0 : index
    %c0_0 = arith.constant 0 : index
    %0 = vector.load %arg1[%c0, %c0_0] : memref<64x128xbf16, #tpu.memory_space<vmem>>, vector<64x128xbf16>
    %c0_1 = arith.constant 0 : index
    %c0_2 = arith.constant 0 : index
    %1 = vector.load %arg2[%c0_1, %c0_2] : memref<128x128xbf16, #tpu.memory_space<vmem>>, vector<128x128xbf16>
    %cst = arith.constant dense<0.000000e+00> : vector<64x128xf32>
    %2 = tpu.matmul %0, %1, %cst {dimension_numbers = #tpu.dot_dimension_numbers<[1], [0], [0], [1], [0, 0, 1, 1], [], []>} : vector<64x128xbf16>, vector<128x128xbf16>, vector<64x128xf32> -> vector<64x128xf32>
    %cst_3 = arith.constant 0.000000e+00 : f32
    %3 = vector.broadcast %cst_3 : f32 to vector<64x128xf32>
    %4 = arith.cmpf oge, %2, %3 : vector<64x128xf32>
    %cst_4 = arith.constant 2.000000e-01 : f32
    %5 = vector.broadcast %cst_4 : f32 to vector<64x128xf32>
    %6 = arith.mulf %5, %2 : vector<64x128xf32>
    %7 = arith.select %4, %2, %6 : vector<64x128xi1>, vector<64x128xf32>
    %8 = tpu.transpose %7, [1, 0] : vector<64x128xf32> -> vector<128x64xf32>
    %9 = vector.extract_strided_slice %8 {offsets = [0, 0], sizes = [8, 64], strides = [1, 1]} : vector<128x64xf32> to vector<8x64xf32>
    %c0_5 = arith.constant 0 : index
    %c0_6 = arith.constant 0 : index
    %c0_7 = arith.constant 0 : index
    %10 = vector.load %arg3[%c0_5, %c0_6, %c0_7] : memref<1x8x64xf32, #tpu.memory_space<vmem>>, vector<1x8x64xf32>
    %11 = vector.shape_cast %10 : vector<1x8x64xf32> to vector<8x64xf32>
    %12 = vector.shape_cast %9 : vector<8x64xf32> to vector<1x8x64xf32>
    tpu.vector_store %arg3[%c0_5, %c0_6, %c0_7], %12 {strides = array<i32>} : memref<1x8x64xf32, #tpu.memory_space<vmem>>, vector<1x8x64xf32>,
    return
  }
  func.func @transform_0(%arg0: i32) -> (i32, i32) {
    %c0_i32 = arith.constant 0 : i32
    %c0_i32_0 = arith.constant 0 : i32
    return %arg0, %c0_i32 : i32, i32
  }
  func.func @transform_1(%arg0: i32) -> (i32, i32) {
    %c0_i32 = arith.constant 0 : i32
    %c0_i32_0 = arith.constant 0 : i32
    %c0_i32_1 = arith.constant 0 : i32
    return %c0_i32, %c0_i32_0 : i32, i32
  }
  func.func @transform_2(%arg0: i32) -> (i32, i32, i32) {
    %c0_i32 = arith.constant 0 : i32
    %c0_i32_0 = arith.constant 0 : i32
    %c0_i32_1 = arith.constant 0 : i32
    return %arg0, %c0_i32, %c0_i32_0 : i32, i32, i32
  }
}

</mosaic_0001>

<bundles_post_ra>
// kernel: tpu_custom_call.1
= control target key start
LH: loop header
LB: loop body
LE: loop exit
PB: predicated region body
PF: predicated region fallthrough
CT: control target
= control target key end

     0   :  { %7 = vsyncpa [#allocation3], 0  ;;  %s1006_s0 = inlined_call_operand.hbm [shape: bf16[128,128], index: 0, kind: input, shape index: {}]   ;;  %s1007_s1 = inlined_call_operand.hbm [shape: bf16[128,128], index: 1, kind: input, shape index: {}]   ;;  %s1008_s2 = inlined_call_operand.hbm [shape: f32[2,8,64], index: 2, kind: output, shape index: {}]  }
   0x1   :  { %9 = vsyncpa [#allocation3 + $0x1], 0 }
   0x2   :  { %10 = vsyncpa [#allocation6], 0 }
   0x3   :  { %11 = vsyncpa [#allocation4], 0 }
   0x4   :  { %13 = vsyncpa [#allocation4 + $0x1], 0  ;;  %s794_s9 = smov 0   ;;  %s796_s10 = smov 0  }
   0x5   :  { %s798_s11 = smov 0   ;;  %s800_s12 = smov 0  }
   0x6 LB: > { %s815_s13 = sadd.s32 4294967295, %s772_s12   ;;  %s492_s14 = sadd.s32 4294967294, %s772_s12   ;;  %s772_s12 = sphi %s800_s12, %s1028_s12   ;;  %s768_s11 = sphi %s798_s11, %s1027_s11   ;;  %s764_s10 = sphi %s796_s10, %s1026_s10   ;;  %s760_s9 = sphi %s794_s9, %s1025_s9  }
   0x7   : > { %p39_p0 = scmp.ne.s32.totalorder %s764_s10, %s760_s9  ;;  %p1009_p1 = scmp.eq.s32.totalorder %s815_s13, 0 }
   0x8   : > { %p90_p3 = scmp.eq.s32.totalorder %s492_s14, 1  ;;  %p493_p5 = scmp.ge.s32.totalorder %s772_s12, 1 }
   0x9   : > { %p824_p4 = por %p1009_p1, %p39_p0  ;;  %p97_p7 = scmp.lt.s32.totalorder %s772_s12, 3 }
   0xa   : > { %p829_p6 = por %p90_p3, %p39_p0  ;;  %s774_s18 = smov [#allocation5]  }
   0xb   : > { %s1012_s15 = scalar_select %p824_p4, 1, 0 }
   0xc   : > { %s1013_s16 = scalar_select %p829_p6, 1, 0 }
   0xd   : > { %p834_p8 = pnand %p493_p5, %p97_p7  ;;  %s109_s19 = sshll.u32 %s774_s18, 4  ;;  %s838_s19 = int_to_ptr.vmem [resolvable:$true] %s109_s19 }
   0xe   : > { %s850_s21 = sadd.s32 1, %s772_s12   ;;  %s26_s22 = sadd.s32 1, %s768_s11 }
   0xf   : > { %s1014_s17 = scalar_select %p834_p8, 1, 0 }
  0x10   : > { %p580_p9 = pneg %p834_p8  ;;  %s23_s23 = ssub.s32 %s772_s12, %s850_s21 }
  0x11   : > { %s644_s26 = scalar_lea.hbm %s1007_s1, 1024 }
  0x12   : > { %p845_p11 = pnand %p580_p9, %p1009_p1  ;;  %p645_p12 = scmp.ne.s32.totalorder %s1007_s1, %s644_s26 }
  0x13   : > { %p651_p5 = scmp.lt.u32.totalorder %s644_s26, %s1007_s1 }
  0x14   : > { %p646_p13 = pneg %p845_p11 }
  0x16   : > { %p647_p0 = pnand %p646_p13, %p645_p12 }
  0x18   : > { %p648_p3 = pneg %p647_p0 }
  0x1a   : > { %p653_p7 = pnand %p651_p5, %p648_p3 }
  0x1c   : > { %656 = shalt.err (!%p653_p7)
}
  0x1d   : > { %s657_s3 = scalar_lea.vmem %s838_s19, 1024  ;;  %p665_p2 = scmp.lt.s32.totalorder %s838_s19, %s838_s19 }
  0x1e   : > { %p658_p9 = scmp.ne.s32.totalorder %s838_s19, %s657_s3  ;;  %p666_p6 = scmp.lt.s32.totalorder %s657_s3, %s657_s3 }
  0x20   : > { %p660_p10 = pnand %p658_p9, %p646_p13  ;;  %p667_p4 = por %p666_p6, %p665_p2 }
  0x22   : > { %p661_p1 = pneg %p660_p10 }
  0x24   : > { %p668_p8 = pnand %p667_p4, %p661_p1 }
  0x26   : > { %671 = shalt.err (!%p668_p8)
}
  0x27   : > { %s775_s4 = smov 64   ;;  %s776_s5 = smov 4  }
  0x28   : > { %583 = dma.hbm_to_vmem [thread:$0]  (!%p845_p11), %s1007_s1, 1024, %s838_s19, [#allocation6], %s775_s4, %s775_s4, %s776_s5  }
  0x29   : > { %p24_p1 = scmp.eq.s32.totalorder %s23_s23, 0  ;;  %p33_p2 = scmp.ne.s32.totalorder %s768_s11, %s764_s10 }
  0x2a   : > { %p34_p4 = scmp.eq.s32.totalorder %s772_s12, 0  ;;  %p593_p6 = scmp.lt.s32.totalorder %s772_s12, 2 }
  0x2b   : > { %s884_s8 = scalar_select %p24_p1, %s768_s11, %s26_s22  }
  0x2c   : > { %p35_p8 = por %p34_p4, %p33_p2  ;;  %p1016_p10 = scmp.eq.s32.totalorder %s815_s13, 1 }
  0x2d   : > { %s123_s18 = sand.u32 1, %s768_s11   ;;  %s519_s20 = sshll.u32 %s772_s12, 9 }
  0x2e   : > { %p888_p12 = por %p1016_p10, %p33_p2  ;;  %s496_s24 = sshll.u32 %s123_s18, 5 }
  0x2f   : > { %s897_s27 = scalar_lea.hbm %s1006_s0, %s519_s20  ;;  %s127_s19 = scalar_lea.vmem [#allocation2], %s496_s24 }
  0x30   : > { %s134_s22 = sshll.u32 %s127_s19, 4  ;;  %p899_p11 = pnand %p593_p6, %p35_p8  ;;  %s903_s22 = int_to_ptr.vmem [resolvable:$true] %s134_s22 }
  0x31   : > { %s905_s28 = scalar_lea.sflag [#allocation3], %s123_s18  ;;  %s672_s29 = scalar_lea.hbm %s897_s27, 512 }
  0x32   : > { %p673_p13 = scmp.ne.s32.totalorder %s897_s27, %s672_s29  ;;  %p674_p0 = pneg %p899_p11 }
  0x33   : > { %s677_s6 = scalar_lea.hbm %s1006_s0, 1024  ;;  %p678_p7 = scmp.lt.u32.totalorder %s897_s27, %s1006_s0 }
  0x34   : > { %p675_p3 = pnand %p674_p0, %p673_p13  ;;  %p679_p9 = scmp.lt.u32.totalorder %s677_s6, %s672_s29 }
  0x35   : > { %p681_p2 = scmp.lt.u32.totalorder %s672_s29, %s897_s27 }
  0x36   : > { %p676_p5 = pneg %p675_p3  ;;  %p680_p1 = por %p679_p9, %p678_p7 }
  0x38   : > { %p682_p4 = por %p681_p2, %p680_p1 }
  0x3a   : > { %p683_p6 = pnand %p682_p4, %p676_p5 }
  0x3c   : > { %686 = shalt.err (!%p683_p6)
}
  0x3d   : > { %s687_s18 = scalar_lea.vmem %s903_s22, 512  ;;  %s777_s24 = smov [#allocation2]  }
  0x3e   : > { %p688_p8 = scmp.ne.s32.totalorder %s903_s22, %s687_s18  ;;  %s692_s25 = sshll.u32 %s777_s24, 4  ;;  %s693_s25 = int_to_ptr.vmem [resolvable:$false] %s692_s25 }
  0x3f   : > { %s694_s26 = scalar_lea.vmem %s693_s25, 1024  ;;  %p695_p3 = scmp.lt.s32.totalorder %s903_s22, %s693_s25 }
  0x40   : > { %p690_p10 = pnand %p688_p8, %p674_p0  ;;  %p696_p7 = scmp.lt.s32.totalorder %s694_s26, %s687_s18 }
  0x42   : > { %p691_p13 = pneg %p690_p10  ;;  %p697_p9 = por %p696_p7, %p695_p3 }
  0x44   : > { %p698_p1 = pnand %p697_p9, %p691_p13 }
  0x46   : > { %701 = shalt.err (!%p698_p1)
}
  0x47   : > { %587 = dma.hbm_to_vmem [thread:$0]  (!%p899_p11), %s897_s27, 512, %s903_s22, %s905_s28, %s775_s4, %s775_s4, %s776_s5  }
  0x48   : > { %p1019_p0 = scmp.ne.s32.totalorder %s1014_s17, 0 }
  0x49   : > { %s939_s19 = sand.u32 (!%p1019_p0), 1, %s764_s10   ;;  %p1020_p5 = scmp.ne.s32.totalorder (!%p1019_p0), %s1012_s15, 0 }
  0x4a   : > { %146 = sbr.rel (%p1019_p0) target bundleno = 477 (0x1dd), region = 28  ;;  %s500_s29 = sshll.u32 (!%p1019_p0), %s939_s19, 5 }
  0x4b   : > { %s149_s30 = scalar_lea.sflag (!%p1019_p0), [#allocation3], %s939_s19  ;;  %s943_s3 = scalar_lea.vmem (!%p1019_p0), [#allocation2], %s500_s29 }
  0x51   : > { %747 = dma.done.wait (%p1020_p5), %s149_s30, 512  }
  0x52   : > { %749 = vsyncadd (%p1020_p5), %s149_s30, 4294966784  ;;  %p1021_p11 = scmp.eq.s32.totalorder %s815_s13, 0 }
  0x54   : > { %751 = dma.done.wait (%p1021_p11), [#allocation6], 1024   ;;  %p1022_p2 = pmov %p1021_p11 }
  0x55   : > { %v632_v0 = vld [vmem:[#allocation5] sm:$0xff]   ;;  %v633_v1 = vld [vmem:[#allocation5 + $0x8] sm:$0xff]   ;;  %v634_v2 = vld [vmem:[#allocation5 + $0x10] sm:$0xff]   ;;  %s502_s15 = sshll.u32 %s939_s19, 3  ;;  %s516_s17 = sshll.u32 %s815_s13, 7  ;;  %vm396_vm8 = vcmask 523264  }
  0x56   : > { %753 = vsyncadd (%p1022_p2), [#allocation6], 4294966272  ;;  %532 = vmatprep.subr.bf16.mxu0 %v632_v0  ;;  %556 = vmatprep.subr.bf16.mxu1 %v632_v0  ;;  %v635_v3 = vld [vmem:[#allocation5 + $0x18] sm:$0xff]   ;;  %v640_v4 = vld [vmem:[%s943_s3] sm:$0xff]   ;;  %s176_s4 = scalar_lea.vmem [#allocation7], %s502_s15  ;;  %s962_s23 = scalar_lea.hbm %s1008_s2, %s516_s17 }
  0x57   : > { %533 = vmatpush3.bf16.msra.mxu0 %v632_v0  ;;  %564 = vmatpush3.bf16.msra.mxu1 %v632_v0  ;;  %v642_v5 = vld [vmem:[%s943_s3 + $0x10] sm:$0xff]   ;;  %v636_v6 = vld [vmem:[#allocation5 + $0x20] sm:$0xff]   ;;  %v637_v7 = vld [vmem:[#allocation5 + $0x28] sm:$0xff]   ;;  %s412_s5 = sshll.u32 %s176_s4, 4  ;;  %s399_s28 = scalar_lea.sflag [#allocation4], %s939_s19  ;;  %s964_s5 = int_to_ptr.vmem [resolvable:$true] %s412_s5 }
  0x58   : > { %534 = vmatprep.subr.bf16.mxu0 %v633_v1  ;;  %557 = vmatprep.subr.bf16.mxu1 %v633_v1  ;;  %v638_v8 = vld [vmem:[#allocation5 + $0x30] sm:$0xff]   ;;  %v639_v9 = vld [vmem:[#allocation5 + $0x38] sm:$0xff]   ;;  %v641_v10 = vld [vmem:[%s943_s3 + $0x8] sm:$0xff]   ;;  %s702_s6 = scalar_lea.vmem %s964_s5, 128  ;;  %s778_s13 = smov [#allocation7]  }
  0x59   : > { %548 = vmatprep.mubr.bf16.mxu0 %v640_v4  ;;  %552 = vmatprep.mubr.bf16.mxu1 %v642_v5  ;;  %v643_v11 = vld [vmem:[%s943_s3 + $0x18] sm:$0xff]   ;;  %p703_p4 = scmp.ne.s32.totalorder %s964_s5, %s702_s6  ;;  %s706_s7 = sshll.u32 %s778_s13, 4  ;;  %s707_s7 = int_to_ptr.vmem [resolvable:$false] %s706_s7 }
  0x5a   : > { %s708_s20 = scalar_lea.vmem %s707_s7, 256  ;;  %p709_p10 = scmp.lt.s32.totalorder %s964_s5, %s707_s7 }
  0x5b   : > { %535 = vmatpush3.bf16.msra.mxu0 %v633_v1  ;;  %565 = vmatpush3.bf16.msra.mxu1 %v633_v1  ;;  %p704_p6 = pnand %p703_p4, %p888_p12  ;;  %p710_p13 = scmp.lt.s32.totalorder %s708_s20, %s702_s6 }
  0x5c   : > { %536 = vmatprep.subr.bf16.mxu0 %v634_v2  ;;  %558 = vmatprep.subr.bf16.mxu1 %v634_v2 }
  0x5d   : > { %p705_p8 = pneg %p704_p6  ;;  %p711_p3 = por %p710_p13, %p709_p10 }
  0x5f   : > { %537 = vmatpush3.bf16.msra.mxu0 %v634_v2  ;;  %566 = vmatpush3.bf16.msra.mxu1 %v634_v2  ;;  %p712_p7 = pnand %p711_p3, %p705_p8 }
  0x60   : > { %538 = vmatprep.subr.bf16.mxu0 %v635_v3  ;;  %559 = vmatprep.subr.bf16.mxu1 %v635_v3 }
  0x63   : > { %539 = vmatpush3.bf16.msra.mxu0 %v635_v3  ;;  %567 = vmatpush3.bf16.msra.mxu1 %v635_v3 }
  0x64   : > { %540 = vmatprep.subr.bf16.mxu0 %v636_v6  ;;  %560 = vmatprep.subr.bf16.mxu1 %v636_v6 }
  0x67   : > { %541 = vmatpush3.bf16.msra.mxu0 %v636_v6  ;;  %568 = vmatpush3.bf16.msra.mxu1 %v636_v6 }
  0x68   : > { %542 = vmatprep.subr.bf16.mxu0 %v637_v7  ;;  %561 = vmatprep.subr.bf16.mxu1 %v637_v7 }
  0x6b   : > { %543 = vmatpush3.bf16.msra.mxu0 %v637_v7  ;;  %569 = vmatpush3.bf16.msra.mxu1 %v637_v7 }
  0x6c   : > { %544 = vmatprep.subr.bf16.mxu0 %v638_v8  ;;  %562 = vmatprep.subr.bf16.mxu1 %v638_v8 }
  0x6f   : > { %545 = vmatpush3.bf16.msra.mxu0 %v638_v8  ;;  %570 = vmatpush3.bf16.msra.mxu1 %v638_v8 }
  0x70   : > { %546 = vmatprep.subr.bf16.mxu0 %v639_v9  ;;  %563 = vmatprep.subr.bf16.mxu1 %v639_v9 }
  0x73   : > { %547 = vmatpush3.bf16.msra.mxu0 %v639_v9  ;;  %571 = vmatpush3.bf16.msra.mxu1 %v639_v9 }
  0x76   : > { %549 = vmatmul.mubr.bf16.vlgmr.msra.gmra.mrb[0].mxu0 %v641_v10  ;;  %553 = vmatmul.mubr.bf16.vlgmr.msra.gmra.mrb[0].mxu1 %v643_v11 }
 0x149   : > { %v550_v12 = vpop.f32.mrb[0].mxu0  ;;  %v554_v13 = vpop.f32.mrb[0].mxu1 }
 0x14a   : > { %v309_v14 = vpop.f32.mrb[1].mxu0  ;;  %v325_v15 = vpop.f32.mrb[1].mxu1  ;;  %v350_v23 = vmul.f32 0.2, %v550_v12  ;;  %vm342_vm2 = vcmp.ge.f32.partialorder %v550_v12, 0.0  ;;  %vm346_vm6 = vcmp.ge.f32.partialorder %v554_v13, 0.0 }
 0x14b   : > { %v348_v16 = vmul.f32 0.2, %v309_v14  ;;  %v551_v17 = vpop.f32.mrb[2].mxu0  ;;  %vm340_vm0 = vcmp.ge.f32.partialorder %v309_v14, 0.0  ;;  %v555_v19 = vpop.f32.mrb[2].mxu1  ;;  %vm344_vm4 = vcmp.ge.f32.partialorder %v325_v15, 0.0 }
 0x14c   : > { %v312_v18 = vpop.f32.mrb[3].mxu0  ;;  %v328_v22 = vpop.f32.mrb[3].mxu1  ;;  %v351_v25 = vmul.f32 0.2, %v551_v17  ;;  %v358_v26 = vsel %vm342_vm2, %v550_v12, %v350_v23  ;;  %vm343_vm3 = vcmp.ge.f32.partialorder %v551_v17, 0.0  ;;  %vm347_vm7 = vcmp.ge.f32.partialorder %v555_v19, 0.0 }
 0x14d   : > { %v349_v20 = vmul.f32 0.2, %v312_v18  ;;  %v356_v21 = vsel %vm340_vm0, %v309_v14, %v348_v16  ;;  %vm341_vm1 = vcmp.ge.f32.partialorder %v312_v18, 0.0  ;;  %v352_v27 = vmul.f32 0.2, %v325_v15 }
 0x14e   : > { %364 = vxpose.xlu0.b32.start [1/8] (short) (narrow) %v356_v21, 8  ;;  %v359_v28 = vsel %vm343_vm3, %v551_v17, %v351_v25  ;;  %v353_v29 = vmul.f32 0.2, %v328_v22  ;;  %vm345_vm5 = vcmp.ge.f32.partialorder %v328_v22, 0.0  ;;  %v354_v31 = vmul.f32 0.2, %v554_v13 }
 0x14f   : > { %v357_v24 = vsel %vm341_vm1, %v312_v18, %v349_v20  ;;  %v360_v30 = vsel %vm344_vm4, %v325_v15, %v352_v27  ;;  %v355_v33 = vmul.f32 0.2, %v555_v19 }
 0x150   : > { %v361_v32 = vsel %vm345_vm5, %v328_v22, %v353_v29  ;;  %v362_v34 = vsel %vm346_vm6, %v554_v13, %v354_v31 }
 0x151   : > { %v363_v35 = vsel %vm347_vm7, %v555_v19, %v355_v33 }
 0x152   : > { %365 = vxpose.xlu0.b32.cont [2/8] (short) (narrow) %v357_v24, 8 }
 0x156   : > { %366 = vxpose.xlu0.b32.cont [3/8] (short) (narrow) %v358_v26, 8 }
 0x15a   : > { %367 = vxpose.xlu0.b32.cont [4/8] (short) (narrow) %v359_v28, 8 }
 0x15e   : > { %368 = vxpose.xlu0.b32.cont [5/8] (short) (narrow) %v360_v30, 8 }
 0x162   : > { %369 = vxpose.xlu0.b32.cont [6/8] (short) (narrow) %v361_v32, 8 }
 0x166   : > { %370 = vxpose.xlu0.b32.cont [7/8] (short) (narrow) %v362_v34, 8 }
 0x16a   : > { %371 = vxpose.xlu0.b32.end [8/8] (short) (narrow) %v363_v35, 8 }
 0x1ce   : > { %v380_v36 = vpop.trf.xlu0 }
 0x1cf   : > { %397 = vst.msk [vmem:[%s176_s4] sm:$0xff] %vm396_vm8, %v380_v36 }
 0x1d0   : > { %715 = shalt.err (!%p712_p7)
}
 0x1d1   : > { %s716_s18 = scalar_lea.hbm %s962_s23, 128  ;;  %s720_s26 = scalar_lea.hbm %s1008_s2, 256 }
 0x1d2   : > { %p717_p9 = scmp.ne.s32.totalorder %s962_s23, %s716_s18  ;;  %p721_p5 = scmp.lt.u32.totalorder %s962_s23, %s1008_s2 }
 0x1d3   : > { %p722_p11 = scmp.lt.u32.totalorder %s720_s26, %s716_s18  ;;  %p724_p4 = scmp.lt.u32.totalorder %s716_s18, %s962_s23 }
 0x1d4   : > { %p718_p1 = pnand %p717_p9, %p888_p12 }
 0x1d5   : > { %p723_p2 = por %p722_p11, %p721_p5 }
 0x1d6   : > { %p719_p0 = pneg %p718_p1 }
 0x1d7   : > { %p725_p6 = por %p724_p4, %p723_p2 }
 0x1d9   : > { %p726_p8 = pnand %p725_p6, %p719_p0 }
 0x1db   : > { %729 = shalt.err (!%p726_p8)
}
 0x1dc   : > { %578 = dma.vmem_to_hbm [thread:$0]  (%p888_p12), %s964_s5, 128, %s962_s23, %s399_s28  }
 0x1dd PF: > { %s424_s30 = sand.u32 1, %s760_s9   ;;  %p1023_p10 = scmp.ne.s32.totalorder %s1013_s16, 0 }
 0x1de   : > { %p1024_p13 = scmp.ge.s32.totalorder %s772_s12, 2  ;;  %s425_s3 = scalar_lea.sflag [#allocation4], %s424_s30 }
 0x1e0   : > { %p589_p3 = pnand %p1024_p13, %p1023_p10 }
 0x1e2   : > { %755 = dma.done.wait (!%p589_p3), %s425_s3, 128  }
 0x1e3   : > { %757 = vsyncadd (!%p589_p3), %s425_s3, 4294967168  ;;  %p16_p7 = scmp.ge.s32.totalorder %s850_s21, 4   ;;  %s1025_s9 = smov %s764_s10 }
 0x1e4   : > { %s1026_s10 = smov %s768_s11  ;;  %s1027_s11 = smov %s884_s8 }
 0x1e5   : > { %s1028_s12 = smov %s850_s21  ;;  %18 = sbr.rel (!%p16_p7) target bundleno = 6 (0x6), region = 77 }
 0x1ec   :  { %430 = vsyncpa [#allocation3], 1 }
 0x1ed   :  { %432 = vsyncpa [#allocation3 + $0x1], 1 }
 0x1ee   :  { %433 = vsyncpa [#allocation6], 1 }
 0x1ef   :  { %434 = vsyncpa [#allocation4], 1 }
 0x1f0   :  { %436 = vsyncpa [#allocation4 + $0x1], 1 }

</bundles_post_ra>
